<compile_context>
chip_gen: v7x
topology: tpu7x:2x2x1
jax: 0.10.0
libtpu: 0.0.40
codegen_flags: <defaults>
</compile_context>

<pallas_src>
import math

import jax
import jax.numpy as jnp
from jax.experimental import pallas as pl
from jax.experimental.pallas import tpu as pltpu


def _affine_kernel(x_ref, w_ref, b_ref, o_ref):
    # One fused affine map per batch tile: [TB, Kf] @ [Kf, Nf] + [1, Nf] -> [TB, Nf]
    y = jnp.dot(x_ref[...], w_ref[...], preferred_element_type=jnp.float32)
    o_ref[...] = (y + b_ref[...]).astype(o_ref.dtype)


def _round_up(n, m):
    return ((n + m - 1) // m) * m


def _round_down(n, m):
    return (n // m) * m


def _choose_fold(F, C, *, max_k=1024, max_fold=128):
    """Rows folded into the lane dim: make the contraction a multiple of 128,
    then grow until the output tile is lane-dense (fold*C >= 128)."""
    fold = 128 // math.gcd(F, 128)
    while fold * C < 128 and fold * 2 * F <= max_k and fold * 2 <= max_fold:
        fold *= 2
    return min(fold, max_fold)


def tabular_regression(x, hidden_w, hidden_b, fc_w, fc_b, *,
                       use_bf16=False,
                       target_tile_bytes=4 << 20,
                       min_pallas_batch=4096,
                       force_pallas=False):
    """Forward pass of TabularRegression.

    x:        [B, F]
    hidden_w: [H, F]   (PyTorch nn.Linear layout: [out, in])
    hidden_b: [H]
    fc_w:     [C, H]
    fc_b:     [C]
    returns   [B, C]
    """
    B, F = x.shape
    C = fc_w.shape[0]
    out_dtype = x.dtype

    # One-time algebraic collapse of the activation-free two-layer MLP:
    #   (x @ W1^T + b1) @ W2^T + b2  ==  x @ (W1^T @ W2^T) + (b1 @ W2^T + b2)
    wc = jnp.dot(hidden_w.T, fc_w.T)            # [F, C], f32
    bc = jnp.dot(hidden_b, fc_w.T) + fc_b       # [C],    f32

    # Small-batch fallback: a 1-step pallas_call pays microseconds of fixed
    # overhead for nanoseconds of work; plain XLA is strictly faster there.
    if B < min_pallas_batch and not force_pallas:
        return (jnp.dot(x, wc) + bc).astype(out_dtype)

    # ---- batch-fold: pack `fold` rows into the lane dimension (layout only) ----
    fold = _choose_fold(F, C)
    rem = B % fold
    b_main = B - rem
    if b_main == 0:
        # Too few rows to fold; not worth a kernel launch.
        return (jnp.dot(x, wc) + bc).astype(out_dtype)

    Kf, Nf = fold * F, fold * C
    rows_f = b_main // fold

    x_main = x[:b_main]
    w_block = jnp.kron(jnp.eye(fold, dtype=wc.dtype), wc)            # [Kf, Nf]
    b_block = jnp.tile(bc, fold).reshape(1, Nf).astype(jnp.float32)  # [1, Nf]

    if use_bf16:
        # Halves x HBM traffic; accumulation stays f32 in-kernel.
        x_main = x_main.astype(jnp.bfloat16)
        w_block = w_block.astype(jnp.bfloat16)
    xf = x_main.reshape(rows_f, Kf)   # free: rows are row-major contiguous

    # ---- batch-tile size: big tiles to amortize grid-step overhead, capped ----
    in_itemsize = jnp.dtype(xf.dtype).itemsize
    out_itemsize = jnp.dtype(out_dtype).itemsize
    sub = 16 if use_bf16 else 8                     # sublane packing of x tile
    tb = max(sub, _round_down(target_tile_bytes // (Kf * in_itemsize), sub))
    if rows_f >= 2 * sub:
        # Keep >=2 grid steps so the pipeline overlaps DMA/compute and the
        # ("parallel",) batch axis can shard across both v7x TensorCores.
        tb = min(tb, max(_round_down(rows_f // 2, sub), sub))
    tb = min(tb, _round_up(rows_f, sub))

    grid = (pl.cdiv(rows_f, tb),)

    # Double-buffered x/out tiles + resident weight/bias, with headroom;
    # capped at 64 MiB (v7x physical VMEM per TensorCore).
    vmem_need = (2 * tb * Kf * in_itemsize + 2 * tb * Nf * out_itemsize
                 + Kf * Nf * in_itemsize + Nf * 4)
    vmem_limit = min(64 << 20, max(32 << 20, int(vmem_need * 2)))

    cost = pl.CostEstimate(
        flops=2 * rows_f * Kf * Nf,
        transcendentals=0,
        bytes_accessed=(rows_f * Kf * in_itemsize + rows_f * Nf * out_itemsize
                        + Kf * Nf * in_itemsize + Nf * 4),
    )

    out_f = pl.pallas_call(
        _affine_kernel,
        out_shape=jax.ShapeDtypeStruct((rows_f, Nf), out_dtype),
        grid=grid,
        in_specs=[
            pl.BlockSpec((tb, Kf), lambda i: (i, 0)),   # x: streamed per batch tile
            pl.BlockSpec((Kf, Nf), lambda i: (0, 0)),   # block-diag Wc: resident
            pl.BlockSpec((1, Nf), lambda i: (0, 0)),    # tiled bias:    resident
        ],
        out_specs=pl.BlockSpec((tb, Nf), lambda i: (i, 0)),
        compiler_params=pltpu.CompilerParams(
            dimension_semantics=("parallel",),
            vmem_limit_bytes=vmem_limit,
        ),
        cost_estimate=cost,
    )(xf, w_block, b_block)

    out_main = out_f.reshape(b_main, C)   # unfold: free row-major reshape

    if rem:
        # Ragged tail handled by XLA; avoids a full-array pad copy of x.
        out_tail = (jnp.dot(x[b_main:], wc) + bc).astype(out_dtype)
        return jnp.concatenate([out_main, out_tail], axis=0)
    return out_main


def _reference(x, hidden_w, hidden_b, fc_w, fc_b):
    return (x @ hidden_w.T + hidden_b) @ fc_w.T + fc_b


if __name__ == "__main__":
    # Small tabular shapes consistent with the module (B large enough to fold).
    B, num_features, num_hidden, num_classes = 512, 16, 32, 4

    key = jax.random.PRNGKey(0)
    kx, k1, k2, k3, k4 = jax.random.split(key, 5)

    x = jax.random.normal(kx, (B, num_features), dtype=jnp.float32)

    # Parameters in PyTorch nn.Linear layout ([out, in]).
    hidden_w = jax.random.normal(k1, (num_hidden, num_features), dtype=jnp.float32) * 0.1
    hidden_b = jax.random.normal(k2, (num_hidden,), dtype=jnp.float32) * 0.1
    fc_w = jax.random.normal(k3, (num_classes, num_hidden), dtype=jnp.float32) * 0.1
    fc_b = jax.random.normal(k4, (num_classes,), dtype=jnp.float32) * 0.1

    ref = _reference(x, hidden_w, hidden_b, fc_w, fc_b)

    # f32 Pallas path (matches the two-matmul reference to 1e-5).
    out = tabular_regression(x, hidden_w, hidden_b, fc_w, fc_b,
                             use_bf16=False, force_pallas=True)
    out = jax.block_until_ready(out)
    assert out.shape == (B, num_classes), out.shape
    assert jnp.allclose(out, ref, atol=1e-5, rtol=1e-5), "f32 mismatch vs reference"

    # bf16-streamed Pallas path (x/Wc in bf16, f32 accumulate): looser tolerance.
    out_bf16 = tabular_regression(x, hidden_w, hidden_b, fc_w, fc_b,
                                  use_bf16=True, force_pallas=True)
    out_bf16 = jax.block_until_ready(out_bf16)
    assert jnp.allclose(out_bf16, ref, atol=5e-2, rtol=5e-2), "bf16 mismatch vs reference"

    # Small-batch XLA fallback path (documented policy, now actually enforced).
    out_small = tabular_regression(x[:8], hidden_w, hidden_b, fc_w, fc_b)
    out_small = jax.block_until_ready(out_small)
    assert jnp.allclose(out_small, ref[:8], atol=1e-5, rtol=1e-5), "fallback mismatch"

    print("KERNEL_OK")
</pallas_src>

<mosaic_0001>
module attributes {stable_mosaic.version = 11 : i64} {
  func.func @_affine_kernel(%arg0: i32, %arg1: memref<8x512xf32, #tpu.memory_space<vmem>>, %arg2: memref<512x128xf32, #tpu.memory_space<vmem>>, %arg3: memref<1x128xf32, #tpu.memory_space<vmem>>, %arg4: memref<8x128xf32, #tpu.memory_space<vmem>>) attributes {dimension_semantics = [#tpu.dimension_semantics<parallel>], iteration_bounds = array<i64: 2>, scalar_prefetch = 0 : i64, scratch_operands = 0 : i64, tpu.core_type = #tpu.core_type<tc>, window_params = [{transform_indices = @transform_0, window_bounds = array<i64: 8, 512>}, {pipeline_mode = #tpu.pipeline_mode<synchronous>, transform_indices = @transform_1, window_bounds = array<i64: 512, 128>}, {pipeline_mode = #tpu.pipeline_mode<synchronous>, transform_indices = @transform_2, window_bounds = array<i64: 1, 128>}, {transform_indices = @transform_3, window_bounds = array<i64: 8, 128>}]} {
    %c0 = arith.constant 0 : index
    %c0_0 = arith.constant 0 : index
    %0 = vector.load %arg1[%c0, %c0_0] : memref<8x512xf32, #tpu.memory_space<vmem>>, vector<8x512xf32>
    %c0_1 = arith.constant 0 : index
    %c0_2 = arith.constant 0 : index
    %1 = vector.load %arg2[%c0_1, %c0_2] : memref<512x128xf32, #tpu.memory_space<vmem>>, vector<512x128xf32>
    %cst = arith.constant dense<0.000000e+00> : vector<8x128xf32>
    %2 = tpu.matmul %0, %1, %cst {dimension_numbers = #tpu.dot_dimension_numbers<[1], [0], [0], [1], [0, 0, 1, 1], [], []>} : vector<8x512xf32>, vector<512x128xf32>, vector<8x128xf32> -> vector<8x128xf32>
    %c0_3 = arith.constant 0 : index
    %c0_4 = arith.constant 0 : index
    %3 = vector.load %arg3[%c0_3, %c0_4] : memref<1x128xf32, #tpu.memory_space<vmem>>, vector<1x128xf32>
    %4 = vector.broadcast %3 : vector<1x128xf32> to vector<8x128xf32>
    %5 = arith.addf %2, %4 : vector<8x128xf32>
    %c0_5 = arith.constant 0 : index
    %c0_6 = arith.constant 0 : index
    %6 = vector.load %arg4[%c0_5, %c0_6] : memref<8x128xf32, #tpu.memory_space<vmem>>, vector<8x128xf32>
    tpu.vector_store %arg4[%c0_5, %c0_6], %5 {strides = array<i32>} : memref<8x128xf32, #tpu.memory_space<vmem>>, vector<8x128xf32>,
    return
  }
  func.func @transform_0(%arg0: i32) -> (i32, i32) {
    %c0_i32 = arith.constant 0 : i32
    %c0_i32_0 = arith.constant 0 : i32
    return %arg0, %c0_i32 : i32, i32
  }
  func.func @transform_1(%arg0: i32) -> (i32, i32) {
    %c0_i32 = arith.constant 0 : i32
    %c0_i32_0 = arith.constant 0 : i32
    %c0_i32_1 = arith.constant 0 : i32
    return %c0_i32, %c0_i32_0 : i32, i32
  }
  func.func @transform_2(%arg0: i32) -> (i32, i32) {
    %c0_i32 = arith.constant 0 : i32
    %c0_i32_0 = arith.constant 0 : i32
    %c0_i32_1 = arith.constant 0 : i32
    return %c0_i32, %c0_i32_0 : i32, i32
  }
  func.func @transform_3(%arg0: i32) -> (i32, i32) {
    %c0_i32 = arith.constant 0 : i32
    %c0_i32_0 = arith.constant 0 : i32
    return %arg0, %c0_i32 : i32, i32
  }
}

</mosaic_0001>

<bundles_post_ra>
// kernel: tpu_custom_call.1
= control target key start
LH: loop header
LB: loop body
LE: loop exit
PB: predicated region body
PF: predicated region fallthrough
CT: control target
= control target key end

     0   :  { %8 = vsyncpa [#allocation3], 0  ;;  %s1083_s0 = inlined_call_operand.hbm [shape: f32[16,512], index: 0, kind: input, shape index: {}]   ;;  %s1084_s1 = inlined_call_operand.hbm [shape: f32[512,128], index: 1, kind: input, shape index: {}]   ;;  %s1085_s2 = inlined_call_operand.vmem [shape: f32[1,128], index: 2, kind: input, shape index: {}]   ;;  %s1086_s3 = inlined_call_operand.hbm [shape: f32[16,128], index: 3, kind: output, shape index: {}]  }
   0x1   :  { %10 = vsyncpa [#allocation3 + $0x1], 0 }
   0x2   :  { %11 = vsyncpa [#allocation6], 0 }
   0x3   :  { %12 = vsyncpa [#allocation4], 0 }
   0x4   :  { %14 = vsyncpa [#allocation4 + $0x1], 0  ;;  %s877_s12 = smov 0   ;;  %s879_s13 = smov 0  }
   0x5   :  { %s881_s14 = smov 0   ;;  %s883_s15 = smov 0  }
   0x6 LB: > { %s898_s16 = sadd.s32 4294967295, %s850_s15   ;;  %s512_s17 = sadd.s32 4294967294, %s850_s15   ;;  %s850_s15 = sphi %s883_s15, %s1106_s15   ;;  %s846_s14 = sphi %s881_s14, %s1105_s14   ;;  %s842_s13 = sphi %s879_s13, %s1104_s13   ;;  %s838_s12 = sphi %s877_s12, %s1103_s12  }
   0x7   : > { %p40_p0 = scmp.ne.s32.totalorder %s842_s13, %s838_s12  ;;  %p1087_p1 = scmp.eq.s32.totalorder %s898_s16, 0 }
   0x8   : > { %p112_p3 = scmp.eq.s32.totalorder %s512_s17, 1  ;;  %p513_p5 = scmp.ge.s32.totalorder %s850_s15, 1 }
   0x9   : > { %p907_p4 = por %p1087_p1, %p40_p0  ;;  %p119_p7 = scmp.lt.s32.totalorder %s850_s15, 3 }
   0xa   : > { %p912_p6 = por %p112_p3, %p40_p0  ;;  %s852_s21 = smov [#allocation5]  }
   0xb   : > { %s1090_s18 = scalar_select %p907_p4, 1, 0 }
   0xc   : > { %s1091_s19 = scalar_select %p912_p6, 1, 0 }
   0xd   : > { %p917_p8 = pnand %p513_p5, %p119_p7  ;;  %s131_s22 = sshll.u32 %s852_s21, 4  ;;  %s921_s22 = int_to_ptr.vmem [resolvable:$true] %s131_s22 }
   0xe   : > { %s933_s24 = sadd.s32 1, %s850_s15   ;;  %s27_s25 = sadd.s32 1, %s846_s14 }
   0xf   : > { %s1092_s20 = scalar_select %p917_p8, 1, 0 }
  0x10   : > { %p671_p9 = pneg %p917_p8  ;;  %s24_s26 = ssub.s32 %s850_s15, %s933_s24 }
  0x11   : > { %s722_s29 = scalar_lea.hbm %s1084_s1, 8192 }
  0x12   : > { %p928_p11 = pnand %p671_p9, %p1087_p1  ;;  %p723_p12 = scmp.ne.s32.totalorder %s1084_s1, %s722_s29 }
  0x13   : > { %p729_p5 = scmp.lt.u32.totalorder %s722_s29, %s1084_s1 }
  0x14   : > { %p724_p13 = pneg %p928_p11 }
  0x16   : > { %p725_p0 = pnand %p724_p13, %p723_p12 }
  0x18   : > { %p726_p3 = pneg %p725_p0 }
  0x1a   : > { %p731_p7 = pnand %p729_p5, %p726_p3 }
  0x1c   : > { %734 = shalt.err (!%p731_p7)
}
  0x1d   : > { %s735_s7 = scalar_lea.vmem %s921_s22, 8192  ;;  %p743_p2 = scmp.lt.s32.totalorder %s921_s22, %s921_s22 }
  0x1e   : > { %p736_p9 = scmp.ne.s32.totalorder %s921_s22, %s735_s7  ;;  %p744_p6 = scmp.lt.s32.totalorder %s735_s7, %s735_s7 }
  0x20   : > { %p738_p10 = pnand %p736_p9, %p724_p13  ;;  %p745_p4 = por %p744_p6, %p743_p2 }
  0x22   : > { %p739_p1 = pneg %p738_p10 }
  0x24   : > { %p746_p8 = pnand %p745_p4, %p739_p1 }
  0x26   : > { %749 = shalt.err (!%p746_p8)
}
  0x27   : > { %s853_s8 = smov 128   ;;  %s854_s9 = smov 8  }
  0x28   : > { %674 = dma.hbm_to_vmem [thread:$0]  (!%p928_p11), %s1084_s1, 8192, %s921_s22, [#allocation6], %s853_s8, %s853_s8, %s854_s9  }
  0x29   : > { %p25_p2 = scmp.eq.s32.totalorder %s24_s26, 0  ;;  %p34_p1 = scmp.ne.s32.totalorder %s846_s14, %s842_s13 }
  0x2a   : > { %p35_p4 = scmp.eq.s32.totalorder %s850_s15, 0  ;;  %p684_p6 = scmp.lt.s32.totalorder %s850_s15, 2 }
  0x2b   : > { %s964_s17 = scalar_select %p25_p2, %s846_s14, %s27_s25  }
  0x2c   : > { %p36_p8 = por %p35_p4, %p34_p1  ;;  %p1094_p10 = scmp.eq.s32.totalorder %s898_s16, 1 }
  0x2d   : > { %s148_s27 = sand.u32 1, %s846_s14   ;;  %s528_s28 = sshll.u32 %s850_s15, 9 }
  0x2e   : > { %p968_p12 = por %p1094_p10, %p34_p1  ;;  %s516_s29 = sshll.u32 %s148_s27, 5 }
  0x2f   : > { %s977_s4 = scalar_lea.hbm %s1083_s0, %s528_s28  ;;  %s152_s22 = scalar_lea.vmem [#allocation2], %s516_s29 }
  0x30   : > { %s160_s25 = sshll.u32 %s152_s22, 4  ;;  %p979_p11 = pnand %p684_p6, %p36_p8  ;;  %s983_s25 = int_to_ptr.vmem [resolvable:$true] %s160_s25 }
  0x31   : > { %s149_s5 = scalar_lea.sflag [#allocation3], %s148_s27  ;;  %s750_s6 = scalar_lea.hbm %s977_s4, 512 }
  0x32   : > { %p751_p13 = scmp.ne.s32.totalorder %s977_s4, %s750_s6  ;;  %p752_p0 = pneg %p979_p11 }
  0x33   : > { %s755_s9 = scalar_lea.hbm %s1083_s0, 1024  ;;  %p756_p7 = scmp.lt.u32.totalorder %s977_s4, %s1083_s0 }
  0x34   : > { %p753_p3 = pnand %p752_p0, %p751_p13  ;;  %p757_p9 = scmp.lt.u32.totalorder %s755_s9, %s750_s6 }
  0x35   : > { %p759_p1 = scmp.lt.u32.totalorder %s750_s6, %s977_s4 }
  0x36   : > { %p754_p5 = pneg %p753_p3  ;;  %p758_p2 = por %p757_p9, %p756_p7 }
  0x38   : > { %p760_p4 = por %p759_p1, %p758_p2 }
  0x3a   : > { %p761_p6 = pnand %p760_p4, %p754_p5 }
  0x3c   : > { %764 = shalt.err (!%p761_p6)
}
  0x3d   : > { %s765_s27 = scalar_lea.vmem %s983_s25, 512  ;;  %s855_s28 = smov [#allocation2]  }
  0x3e   : > { %p766_p8 = scmp.ne.s32.totalorder %s983_s25, %s765_s27  ;;  %s770_s29 = sshll.u32 %s855_s28, 4  ;;  %s771_s29 = int_to_ptr.vmem [resolvable:$false] %s770_s29 }
  0x3f   : > { %s772_s23 = scalar_lea.vmem %s771_s29, 1024  ;;  %p773_p3 = scmp.lt.s32.totalorder %s983_s25, %s771_s29 }
  0x40   : > { %p768_p10 = pnand %p766_p8, %p752_p0  ;;  %p774_p7 = scmp.lt.s32.totalorder %s772_s23, %s765_s27 }
  0x42   : > { %p769_p13 = pneg %p768_p10  ;;  %p775_p9 = por %p774_p7, %p773_p3 }
  0x44   : > { %p776_p2 = pnand %p775_p9, %p769_p13 }
  0x46   : > { %779 = shalt.err (!%p776_p2)
}
  0x47   : > { %678 = dma.hbm_to_vmem [thread:$0]  (!%p979_p11), %s977_s4, 512, %s983_s25, %s149_s5  }
  0x48   : > { %p1097_p5 = scmp.ne.s32.totalorder %s1092_s20, 0 }
  0x49   : > { %s1013_s30 = sand.u32 (!%p1097_p5), 1, %s842_s13   ;;  %p1098_p0 = scmp.ne.s32.totalorder (!%p1097_p5), %s1090_s18, 0 }
  0x4a   : > { %169 = sbr.rel (%p1097_p5) target bundleno = 353 (0x161), region = 32  ;;  %s520_s22 = sshll.u32 (!%p1097_p5), %s1013_s30, 5 }
  0x4b   : > { %s172_s6 = scalar_lea.sflag (!%p1097_p5), [#allocation3], %s1013_s30  ;;  %s1017_s7 = scalar_lea.vmem (!%p1097_p5), [#allocation2], %s520_s22 }
  0x51   : > { %825 = dma.done.wait (%p1098_p0), %s172_s6, 512  }
  0x52   : > { %827 = vsyncadd (%p1098_p0), %s172_s6, 4294966784  ;;  %p1099_p11 = scmp.eq.s32.totalorder %s898_s16, 0 }
  0x54   : > { %829 = dma.done.wait (%p1099_p11), [#allocation6], 8192   ;;  %p1100_p1 = pmov %p1099_p11 }
  0x55   : > { %v222_v0 = vld [vmem:[#allocation5 + $0x80] sm:$0xff]  ;;  %v223_v1 = vld [vmem:[#allocation5 + $0x88] sm:$0xff]  ;;  %v224_v11 = vld [vmem:[#allocation5 + $0x90] sm:$0xff]  ;;  %s522_s18 = sshll.u32 %s1013_s30, 3  ;;  %s525_s25 = sshll.u32 %s898_s16, 7 }
  0x56   : > { %831 = vsyncadd (%p1100_p1), [#allocation6], 4294959104  ;;  %v206_v2 = vld [vmem:[#allocation5] sm:$0xff]  ;;  %v599_v3 = vpack.c.bf16 %v223_v1, %v222_v0  ;;  %v207_v4 = vld [vmem:[#allocation5 + $0x8] sm:$0xff]  ;;  %s201_s26 = scalar_lea.vmem [#allocation7], %s522_s18  ;;  %s1039_s10 = scalar_lea.hbm %s1086_s3, %s525_s25 }
  0x57   : > { %v254_v5 = vld [vmem:[#allocation5 + $0x180] sm:$0xff]  ;;  %v255_v6 = vld [vmem:[#allocation5 + $0x188] sm:$0xff]  ;;  %v601_v7 = vpack.c.bf16 %v207_v4, %v206_v2  ;;  %v225_v13 = vld [vmem:[#allocation5 + $0x98] sm:$0xff]  ;;  %s432_s5 = sshll.u32 %s201_s26, 4  ;;  %s419_s11 = scalar_lea.sflag [#allocation4], %s1013_s30  ;;  %s1041_s5 = int_to_ptr.vmem [resolvable:$true] %s432_s5 }
  0x58   : > { %v631_v8 = vpack.c.bf16 %v255_v6, %v254_v5  ;;  %v238_v9 = vld [vmem:[#allocation5 + $0x100] sm:$0xff]  ;;  %v239_v10 = vld [vmem:[#allocation5 + $0x108] sm:$0xff]  ;;  %600 = vmatprep.subr.bf16.mxu0 %v599_v3  ;;  %v208_v14 = vld [vmem:[#allocation5 + $0x10] sm:$0xff]  ;;  %v603_v16 = vpack.c.bf16 %v225_v13, %v224_v11  ;;  %s780_s27 = scalar_lea.vmem %s1041_s5, 128  ;;  %s856_s16 = smov [#allocation7]  }
  0x59   : > { %v633_v12 = vpack.c.bf16 %v239_v10, %v238_v9  ;;  %v209_v15 = vld [vmem:[#allocation5 + $0x18] sm:$0xff]  ;;  %602 = vmatpush3.bf16.msra.mxu0 %v601_v7  ;;  %v256_v18 = vld [vmem:[#allocation5 + $0x190] sm:$0xff]  ;;  %v226_v23 = vld [vmem:[#allocation5 + $0xa0] sm:$0xff]  ;;  %p781_p4 = scmp.ne.s32.totalorder %s1041_s5, %s780_s27  ;;  %s784_s28 = sshll.u32 %s856_s16, 4  ;;  %s785_s28 = int_to_ptr.vmem [resolvable:$false] %s784_s28 }
  0x5a   : > { %632 = vmatprep.subr.bf16.mxu1 %v631_v8  ;;  %v605_v17 = vpack.c.bf16 %v209_v15, %v208_v14  ;;  %v257_v19 = vld [vmem:[#allocation5 + $0x198] sm:$0xff]  ;;  %v240_v20 = vld [vmem:[#allocation5 + $0x110] sm:$0xff]  ;;  %v227_v24 = vld [vmem:[#allocation5 + $0xa8] sm:$0xff]  ;;  %604 = vmatprep.subr.bf16.mxu0 %v603_v16  ;;  %s786_s29 = scalar_lea.vmem %s785_s28, 256  ;;  %p787_p10 = scmp.lt.s32.totalorder %s1041_s5, %s785_s28 }
  0x5b   : > { %634 = vmatpush3.bf16.msra.mxu1 %v633_v12  ;;  %v635_v21 = vpack.c.bf16 %v257_v19, %v256_v18  ;;  %v241_v22 = vld [vmem:[#allocation5 + $0x118] sm:$0xff]  ;;  %v607_v26 = vpack.c.bf16 %v227_v24, %v226_v23  ;;  %v210_v27 = vld [vmem:[#allocation5 + $0x20] sm:$0xff]  ;;  %v211_v28 = vld [vmem:[#allocation5 + $0x28] sm:$0xff]  ;;  %p782_p6 = pnand %p781_p4, %p968_p12  ;;  %p788_p13 = scmp.lt.s32.totalorder %s786_s29, %s780_s27 }
  0x5c   : > { %v637_v25 = vpack.c.bf16 %v241_v22, %v240_v20  ;;  %v258_v29 = vld [vmem:[#allocation5 + $0x1a0] sm:$0xff]  ;;  %v259_v30 = vld [vmem:[#allocation5 + $0x1a8] sm:$0xff]  ;;  %v609_v33 = vpack.c.bf16 %v211_v28, %v210_v27  ;;  %v228_v35 = vld [vmem:[#allocation5 + $0xb0] sm:$0xff] }
  0x5d   : > { %636 = vmatprep.subr.bf16.mxu1 %v635_v21  ;;  %v242_v31 = vld [vmem:[#allocation5 + $0x120] sm:$0xff]  ;;  %v243_v32 = vld [vmem:[#allocation5 + $0x128] sm:$0xff]  ;;  %606 = vmatpush3.bf16.msra.mxu0 %v605_v17  ;;  %v639_v34 = vpack.c.bf16 %v259_v30, %v258_v29  ;;  %v229_v36 = vld [vmem:[#allocation5 + $0xb8] sm:$0xff]  ;;  %p783_p8 = pneg %p782_p6  ;;  %p789_p3 = por %p788_p13, %p787_p10 }
  0x5e   : > { %v212_v37 = vld [vmem:[#allocation5 + $0x30] sm:$0xff]  ;;  %608 = vmatprep.subr.bf16.mxu0 %v607_v26  ;;  %v641_v38 = vpack.c.bf16 %v243_v32, %v242_v31  ;;  %v611_v39 = vpack.c.bf16 %v229_v36, %v228_v35  ;;  %v213_v40 = vld [vmem:[#allocation5 + $0x38] sm:$0xff]  ;;  %v230_v46 = vld [vmem:[#allocation5 + $0xc0] sm:$0xff] }
  0x5f   : > { %638 = vmatpush3.bf16.msra.mxu1 %v637_v25  ;;  %v260_v41 = vld [vmem:[#allocation5 + $0x1b0] sm:$0xff]  ;;  %v261_v42 = vld [vmem:[#allocation5 + $0x1b8] sm:$0xff]  ;;  %v231_v47 = vld [vmem:[#allocation5 + $0xc8] sm:$0xff]  ;;  %v613_v48 = vpack.c.bf16 %v213_v40, %v212_v37  ;;  %p790_p7 = pnand %p789_p3, %p783_p8 }
  0x60   : > { %640 = vmatprep.subr.bf16.mxu1 %v639_v34  ;;  %v643_v43 = vpack.c.bf16 %v261_v42, %v260_v41  ;;  %v244_v44 = vld [vmem:[#allocation5 + $0x130] sm:$0xff]  ;;  %v245_v45 = vld [vmem:[#allocation5 + $0x138] sm:$0xff]  ;;  %v262_v49 = vld [vmem:[#allocation5 + $0x1c0] sm:$0xff]  ;;  %v615_v52 = vpack.c.bf16 %v231_v47, %v230_v46 }
  0x61   : > { %610 = vmatpush3.bf16.msra.mxu0 %v609_v33  ;;  %v263_v50 = vld [vmem:[#allocation5 + $0x1c8] sm:$0xff]  ;;  %v645_v51 = vpack.c.bf16 %v245_v45, %v244_v44  ;;  %v214_v53 = vld [vmem:[#allocation5 + $0x40] sm:$0xff]  ;;  %v232_v58 = vld [vmem:[#allocation5 + $0xd0] sm:$0xff] }
  0x62   : > { %612 = vmatprep.subr.bf16.mxu0 %v611_v39  ;;  %v215_v54 = vld [vmem:[#allocation5 + $0x48] sm:$0xff]  ;;  %v246_v55 = vld [vmem:[#allocation5 + $0x140] sm:$0xff]  ;;  %v647_v56 = vpack.c.bf16 %v263_v50, %v262_v49  ;;  %v233_v59 = vld [vmem:[#allocation5 + $0xd8] sm:$0xff] }
  0x63   : > { %642 = vmatpush3.bf16.msra.mxu1 %v641_v38  ;;  %v247_v57 = vld [vmem:[#allocation5 + $0x148] sm:$0xff]  ;;  %v264_v60 = vld [vmem:[#allocation5 + $0x1d0] sm:$0xff]  ;;  %v265_v61 = vld [vmem:[#allocation5 + $0x1d8] sm:$0xff]  ;;  %v617_v62 = vpack.c.bf16 %v215_v54, %v214_v53  ;;  %v619_v0 = vpack.c.bf16 %v233_v59, %v232_v58 }
  0x64   : > { %644 = vmatprep.subr.bf16.mxu1 %v643_v43  ;;  %v649_v63 = vpack.c.bf16 %v247_v57, %v246_v55  ;;  %v216_v1 = vld [vmem:[#allocation5 + $0x50] sm:$0xff]  ;;  %v217_v2 = vld [vmem:[#allocation5 + $0x58] sm:$0xff]  ;;  %v651_v4 = vpack.c.bf16 %v265_v61, %v264_v60  ;;  %v234_v6 = vld [vmem:[#allocation5 + $0xe0] sm:$0xff] }
  0x65   : > { %614 = vmatpush3.bf16.msra.mxu0 %v613_v48  ;;  %v248_v3 = vld [vmem:[#allocation5 + $0x150] sm:$0xff]  ;;  %v249_v5 = vld [vmem:[#allocation5 + $0x158] sm:$0xff]  ;;  %v235_v7 = vld [vmem:[#allocation5 + $0xe8] sm:$0xff]  ;;  %v621_v10 = vpack.c.bf16 %v217_v2, %v216_v1 }
  0x66   : > { %616 = vmatprep.subr.bf16.mxu0 %v615_v52  ;;  %v266_v8 = vld [vmem:[#allocation5 + $0x1e0] sm:$0xff]  ;;  %v267_v9 = vld [vmem:[#allocation5 + $0x1e8] sm:$0xff]  ;;  %v653_v13 = vpack.c.bf16 %v249_v5, %v248_v3  ;;  %v623_v14 = vpack.c.bf16 %v235_v7, %v234_v6  ;;  %v236_v19 = vld [vmem:[#allocation5 + $0xf0] sm:$0xff] }
  0x67   : > { %646 = vmatpush3.bf16.msra.mxu1 %v645_v51  ;;  %v218_v11 = vld [vmem:[#allocation5 + $0x60] sm:$0xff]  ;;  %v219_v12 = vld [vmem:[#allocation5 + $0x68] sm:$0xff]  ;;  %v655_v18 = vpack.c.bf16 %v267_v9, %v266_v8  ;;  %v237_v20 = vld [vmem:[#allocation5 + $0xf8] sm:$0xff] }
  0x68   : > { %648 = vmatprep.subr.bf16.mxu1 %v647_v56  ;;  %v250_v15 = vld [vmem:[#allocation5 + $0x160] sm:$0xff]  ;;  %v251_v16 = vld [vmem:[#allocation5 + $0x168] sm:$0xff]  ;;  %v205_v21 = vld [vmem:[%s1017_s7 + $0x18] sm:$0xff]  ;;  %v625_v24 = vpack.c.bf16 %v219_v12, %v218_v11  ;;  %v627_v26 = vpack.c.bf16 %v237_v20, %v236_v19 }
  0x69   : > { %618 = vmatpush3.bf16.msra.mxu0 %v617_v62  ;;  %v203_v17 = vld [vmem:[%s1017_s7 + $0x8] sm:$0xff]  ;;  %v268_v22 = vld [vmem:[#allocation5 + $0x1f0] sm:$0xff]  ;;  %v269_v23 = vld [vmem:[#allocation5 + $0x1f8] sm:$0xff]  ;;  %411 = vmatprep.mubr.f32.mxu1 %v205_v21  ;;  %v657_v25 = vpack.c.bf16 %v251_v16, %v250_v15 }
  0x6a   : > { %620 = vmatprep.subr.bf16.mxu0 %v619_v0  ;;  %341 = vmatprep.mubr.f32.mxu0 %v203_v17  ;;  %v220_v27 = vld [vmem:[#allocation5 + $0x70] sm:$0xff]  ;;  %v221_v28 = vld [vmem:[#allocation5 + $0x78] sm:$0xff]  ;;  %v659_v29 = vpack.c.bf16 %v269_v23, %v268_v22  ;;  %v202_v34 = vld [vmem:[%s1017_s7] sm:$0xff] }
  0x6b   : > { %650 = vmatpush3.bf16.msra.mxu1 %v649_v63  ;;  %v252_v30 = vld [vmem:[#allocation5 + $0x170] sm:$0xff]  ;;  %v253_v31 = vld [vmem:[#allocation5 + $0x178] sm:$0xff]  ;;  %v629_v32 = vpack.c.bf16 %v221_v28, %v220_v27  ;;  %v523_v37 = vld [vmem:[%s1085_s2] ss:$0 sm:$0xff] }
  0x6c   : > { %652 = vmatprep.subr.bf16.mxu1 %v651_v4  ;;  %v661_v33 = vpack.c.bf16 %v253_v31, %v252_v30  ;;  %v204_v35 = vld [vmem:[%s1017_s7 + $0x10] sm:$0xff] }
  0x6d   : > { %622 = vmatpush3.bf16.msra.mxu0 %v621_v10 }
  0x6e   : > { %624 = vmatprep.subr.bf16.mxu0 %v623_v14 }
  0x6f   : > { %654 = vmatpush3.bf16.msra.mxu1 %v653_v13 }
  0x70   : > { %656 = vmatprep.subr.bf16.mxu1 %v655_v18 }
  0x71   : > { %626 = vmatpush3.bf16.msra.mxu0 %v625_v24 }
  0x72   : > { %628 = vmatprep.subr.bf16.mxu0 %v627_v26 }
  0x73   : > { %658 = vmatpush3.bf16.msra.mxu1 %v657_v25 }
  0x74   : > { %660 = vmatprep.subr.bf16.mxu1 %v659_v29 }
  0x75   : > { %630 = vmatpush3.bf16.msra.mxu0 %v629_v32 }
  0x77   : > { %662 = vmatpush3.bf16.msra.mxu1 %v661_v33 }
  0x78   : > { %342 = vmatmul.mubr.f32.vlgmr.msra.gmra.mrb[0].mxu0 %v202_v34 }
  0x7a   : > { %412 = vmatmul.mubr.f32.vlgmr.msra.gmra.mrb[0].mxu1 %v204_v35 }
 0x14b   : > { %v561_v36 = vpop.f32.mrb[0].mxu0 }
 0x14c   : > { %v562_v38 = vpop.f32.mrb[1].mxu0 }
 0x14d   : > { %v596_v39 = vpop.f32.mrb[0].mxu1  ;;  %v563_v40 = vadd.f32 %v562_v38, %v561_v36 }
 0x14e   : > { %v597_v41 = vpop.f32.mrb[1].mxu1 }
 0x14f   : > { %v598_v42 = vadd.f32 %v597_v41, %v596_v39  ;;  %v344_v43 = vadd.f32 %v563_v40, %v523_v37 }
 0x151   : > { %v414_v44 = vadd.f32 %v598_v42, %v344_v43 }
 0x153   : > { %417 = vst [vmem:[%s201_s26] sm:$0xff] %v414_v44 }
 0x154   : > { %793 = shalt.err (!%p790_p7)
}
 0x155   : > { %s794_s23 = scalar_lea.hbm %s1039_s10, 128  ;;  %s798_s6 = scalar_lea.hbm %s1086_s3, 256 }
 0x156   : > { %p795_p9 = scmp.ne.s32.totalorder %s1039_s10, %s794_s23  ;;  %p799_p0 = scmp.lt.u32.totalorder %s1039_s10, %s1086_s3 }
 0x157   : > { %p800_p11 = scmp.lt.u32.totalorder %s798_s6, %s794_s23  ;;  %p802_p4 = scmp.lt.u32.totalorder %s794_s23, %s1039_s10 }
 0x158   : > { %p796_p2 = pnand %p795_p9, %p968_p12 }
 0x159   : > { %p801_p1 = por %p800_p11, %p799_p0 }
 0x15a   : > { %p797_p5 = pneg %p796_p2 }
 0x15b   : > { %p803_p6 = por %p802_p4, %p801_p1 }
 0x15d   : > { %p804_p8 = pnand %p803_p6, %p797_p5 }
 0x15f   : > { %807 = shalt.err (!%p804_p8)
}
 0x160   : > { %669 = dma.vmem_to_hbm [thread:$0]  (%p968_p12), %s1041_s5, 128, %s1039_s10, %s419_s11  }
 0x161 PF: > { %s444_s20 = sand.u32 1, %s838_s12   ;;  %p1101_p10 = scmp.ne.s32.totalorder %s1091_s19, 0 }
 0x162   : > { %p1102_p13 = scmp.ge.s32.totalorder %s850_s15, 2  ;;  %s445_s4 = scalar_lea.sflag [#allocation4], %s444_s20 }
 0x164   : > { %p680_p3 = pnand %p1102_p13, %p1101_p10 }
 0x166   : > { %833 = dma.done.wait (!%p680_p3), %s445_s4, 128  }
 0x167   : > { %835 = vsyncadd (!%p680_p3), %s445_s4, 4294967168  ;;  %p17_p7 = scmp.ge.s32.totalorder %s933_s24, 4   ;;  %s1103_s12 = smov %s842_s13 }
 0x168   : > { %s1104_s13 = smov %s846_s14  ;;  %s1105_s14 = smov %s964_s17 }
 0x169   : > { %s1106_s15 = smov %s933_s24  ;;  %19 = sbr.rel (!%p17_p7) target bundleno = 6 (0x6), region = 81 }
 0x170   :  { %450 = vsyncpa [#allocation3], 1 }
 0x171   :  { %452 = vsyncpa [#allocation3 + $0x1], 1 }
 0x172   :  { %453 = vsyncpa [#allocation6], 1 }
 0x173   :  { %454 = vsyncpa [#allocation4], 1 }
 0x174   :  { %456 = vsyncpa [#allocation4 + $0x1], 1 }

</bundles_post_ra>
